<compile_context>
chip_gen: v7x
topology: tpu7x:2x2x1
jax: 0.10.0
libtpu: 0.0.40
codegen_flags: <defaults>
</compile_context>

<pallas_src>
import math

import jax
import jax.numpy as jnp
from jax.experimental import pallas as pl
from jax.experimental.pallas import tpu as pltpu


def _round_up(x, m):
    return ((x + m - 1) // m) * m


def _make_focal_kernel(*, gamma, size_average, use_alpha, n_rows, tile_n):
    log_min_prob = math.log(1e-4)
    gamma_f = float(gamma)
    gamma_is_small_int = gamma_f == int(gamma_f) and 0 <= int(gamma_f) <= 8

    def kernel(*refs):
        if use_alpha:
            alpha_ref, pred_ref, target_ref, out_ref = refs
        else:
            pred_ref, target_ref, out_ref = refs

        i = pl.program_id(0)

        @pl.when(i == 0)
        def _init():
            out_ref[...] = jnp.zeros_like(out_ref)

        logits = pred_ref[...].astype(jnp.float32)             # (C, TILE_N)
        tgt = target_ref[...]                                  # (1, TILE_N) i32

        # softmax statistics over the class (sublane) axis
        m = jnp.max(logits, axis=0, keepdims=True)             # (1, TILE_N)
        e = jnp.exp(logits - m)
        log_sum = jnp.log(jnp.sum(e, axis=0, keepdims=True))   # (1, TILE_N)

        # one-hot gather of the target-class logit (scatter_ in the reference)
        classes = jax.lax.broadcasted_iota(jnp.int32, logits.shape, 0)
        onehot = (classes == tgt).astype(jnp.float32)          # (C, TILE_N)
        pred_t = jnp.sum(logits * onehot, axis=0, keepdims=True)

        # log(prob[target]) with prob.clamp(min=1e-4, max=1.0) folded in
        log_pt = pred_t - m - log_sum
        log_pt = jnp.clip(log_pt, log_min_prob, 0.0)
        pt = jnp.exp(log_pt)                                   # (1, TILE_N)

        one_minus = 1.0 - pt
        if gamma_is_small_int:
            w = jnp.ones_like(one_minus)
            for _ in range(int(gamma_f)):
                w = w * one_minus                              # VPU, not EUP
        else:
            w = jnp.power(one_minus, gamma_f)

        loss_row = -w * log_pt                                 # (1, TILE_N)

        if use_alpha:
            alpha = alpha_ref[...].astype(jnp.float32)         # (C, 1)
            alpha_t = jnp.sum(alpha * onehot, axis=0, keepdims=True)
            loss_row = loss_row * alpha_t

        # mask padded rows (tile padding beyond the true batch size)
        col = jax.lax.broadcasted_iota(jnp.int32, loss_row.shape, 1)
        row_idx = i * tile_n + col
        loss_row = jnp.where(row_idx < n_rows, loss_row, 0.0)

        out_ref[...] = out_ref[...] + jnp.sum(loss_row)

        @pl.when(i == pl.num_programs(0) - 1)
        def _finalize():
            if size_average:
                out_ref[...] = out_ref[...] / jnp.float32(n_rows)

    return kernel


def focal_loss(pred, target, class_num, *, gamma=2.0, use_alpha=False,
               alpha=None, size_average=True):
    """JAX wrapper matching FocalLoss.forward semantics (f32 math)."""
    pred2 = pred.reshape(-1, class_num)                  # view(-1, class_num)
    n = pred2.shape[0]
    c = class_num

    # Tile sizing: lane-dense (C, TILE_N) tiles, ~4 MiB budget per pred buffer
    # (x2 for double-buffering stays well under the scoped-VMEM limit on
    #  v5e / v6e / v7x).
    budget = 4 * 1024 * 1024
    tile_n = max(128, (budget // (4 * c)) // 128 * 128)
    tile_n = min(tile_n, 2048, _round_up(n, 128))
    n_pad = _round_up(n, tile_n)
    num_tiles = n_pad // tile_n

    # transposed, lane-dense layout: classes on sublanes, rows on lanes
    pred_t = jnp.transpose(pred2.astype(jnp.float32))    # (C, N)
    pred_t = jnp.pad(pred_t, ((0, 0), (0, n_pad - n)))
    tgt = target.reshape(1, -1).astype(jnp.int32)        # (1, N)
    tgt = jnp.pad(tgt, ((0, 0), (0, n_pad - n)))

    kernel = _make_focal_kernel(gamma=gamma, size_average=bool(size_average),
                                use_alpha=bool(use_alpha), n_rows=n,
                                tile_n=tile_n)

    in_specs = [
        pl.BlockSpec((c, tile_n), lambda i: (0, i)),     # pred (C, TILE_N)
        pl.BlockSpec((1, tile_n), lambda i: (0, i)),     # target (1, TILE_N)
    ]
    operands = [pred_t, tgt]
    if use_alpha:
        alpha_arr = jnp.asarray(alpha, dtype=jnp.float32).reshape(c, 1)
        in_specs = [pl.BlockSpec((c, 1), lambda i: (0, 0))] + in_specs
        operands = [alpha_arr] + operands

    out = pl.pallas_call(
        kernel,
        out_shape=jax.ShapeDtypeStruct((1, 1), jnp.float32),
        grid=(num_tiles,),
        in_specs=in_specs,
        out_specs=pl.BlockSpec((1, 1), lambda i: (0, 0)),   # revisited accumulator
        compiler_params=pltpu.CompilerParams(
            dimension_semantics=("arbitrary",),             # reduction axis
            vmem_limit_bytes=32 * 1024 * 1024,
        ),
    )(*operands)
    return out[0, 0]


if __name__ == "__main__":
    CLASS_NUM = 8
    BATCH = 16

    key = jax.random.PRNGKey(0)
    k_pred, k_tgt = jax.random.split(key)

    pred = jax.random.normal(k_pred, (BATCH, CLASS_NUM), dtype=jnp.float32)
    target = jax.random.randint(k_tgt, (BATCH,), 0, CLASS_NUM, dtype=jnp.int32)

    # --- no-alpha, size_average=True (default config) ---
    loss = focal_loss(pred, target, CLASS_NUM, gamma=2.0,
                      use_alpha=False, size_average=True)
    jax.block_until_ready(loss)

    # pure-JAX reference (same f32 math)
    prob = jnp.clip(jax.nn.softmax(pred, axis=1), 1e-4, 1.0)
    onehot = jax.nn.one_hot(target, CLASS_NUM, dtype=jnp.float32)
    per_row = jnp.sum(-((1.0 - prob) ** 2) * jnp.log(prob) * onehot, axis=1)
    ref = jnp.mean(per_row)
    assert jnp.allclose(loss, ref, rtol=1e-4, atol=1e-6), (loss, ref)

    # --- alpha-weighted, size_average=False path ---
    alpha = jnp.linspace(0.5, 1.5, CLASS_NUM, dtype=jnp.float32)
    loss_a = focal_loss(pred, target, CLASS_NUM, gamma=2.0,
                        use_alpha=True, alpha=alpha, size_average=False)
    jax.block_until_ready(loss_a)
    alpha_t = jnp.sum(alpha[None, :] * onehot, axis=1)
    ref_a = jnp.sum(alpha_t * per_row)
    assert jnp.allclose(loss_a, ref_a, rtol=1e-4, atol=1e-6), (loss_a, ref_a)

    print("KERNEL_OK")
</pallas_src>

<mosaic_0001>
module attributes {stable_mosaic.version = 11 : i64} {
  func.func @kernel(%arg0: i32, %arg1: memref<8x128xf32, #tpu.memory_space<vmem>>, %arg2: memref<1x128xi32, #tpu.memory_space<vmem>>, %arg3: memref<1x1xf32, #tpu.memory_space<vmem>>) attributes {dimension_semantics = [#tpu.dimension_semantics<arbitrary>], iteration_bounds = array<i64: 1>, scalar_prefetch = 0 : i64, scratch_operands = 0 : i64, tpu.core_type = #tpu.core_type<tc>, window_params = [{transform_indices = @transform_0, window_bounds = array<i64: 8, 128>}, {transform_indices = @transform_1, window_bounds = array<i64: 1, 128>}, {pipeline_mode = #tpu.pipeline_mode<synchronous>, transform_indices = @transform_2, window_bounds = array<i64: 1, 1>}]} {
    %c0_i32 = arith.constant 0 : i32
    %0 = arith.cmpi eq, %arg0, %c0_i32 : i32
    %1 = arith.extui %0 : i1 to i32
    %c0_i32_0 = arith.constant 0 : i32
    %2 = arith.cmpi ne, %1, %c0_i32_0 : i32
    scf.if %2 {
      %cst_19 = arith.constant 0.000000e+00 : f32
      %55 = vector.broadcast %cst_19 : f32 to vector<1x1xf32>
      %c0_20 = arith.constant 0 : index
      %c0_21 = arith.constant 0 : index
      %56 = vector.load %arg3[%c0_20, %c0_21] : memref<1x1xf32, #tpu.memory_space<vmem>>, vector<1x1xf32>
      tpu.vector_store %arg3[%c0_20, %c0_21], %55 {strides = array<i32>} : memref<1x1xf32, #tpu.memory_space<vmem>>, vector<1x1xf32>,
    } else {
    }
    %c0 = arith.constant 0 : index
    %c0_1 = arith.constant 0 : index
    %3 = vector.load %arg1[%c0, %c0_1] : memref<8x128xf32, #tpu.memory_space<vmem>>, vector<8x128xf32>
    %c0_2 = arith.constant 0 : index
    %c0_3 = arith.constant 0 : index
    %4 = vector.load %arg2[%c0_2, %c0_3] : memref<1x128xi32, #tpu.memory_space<vmem>>, vector<1x128xi32>
    %cst = arith.constant dense<0xFF800000> : vector<128xf32>
    %5 = vector.multi_reduction <maximumf>, %3, %cst [0] : vector<8x128xf32> to vector<128xf32>
    %6 = vector.shape_cast %5 : vector<128xf32> to vector<1x128xf32>
    %7 = vector.broadcast %6 : vector<1x128xf32> to vector<8x128xf32>
    %8 = arith.subf %3, %7 : vector<8x128xf32>
    %9 = math.exp %8 : vector<8x128xf32>
    %cst_4 = arith.constant dense<0.000000e+00> : vector<128xf32>
    %10 = vector.multi_reduction <add>, %9, %cst_4 [0] : vector<8x128xf32> to vector<128xf32>
    %11 = vector.shape_cast %10 : vector<128xf32> to vector<1x128xf32>
    %12 = math.log %11 : vector<1x128xf32>
    %13 = tpu.iota {dimensions = array<i32: 0>} : vector<8x128xi32>
    %14 = vector.broadcast %4 : vector<1x128xi32> to vector<8x128xi32>
    %15 = arith.cmpi eq, %13, %14 : vector<8x128xi32>
    %16 = arith.extui %15 : vector<8x128xi1> to vector<8x128xi32>
    %17 = arith.sitofp %16 : vector<8x128xi32> to vector<8x128xf32>
    %18 = arith.mulf %3, %17 : vector<8x128xf32>
    %cst_5 = arith.constant dense<0.000000e+00> : vector<128xf32>
    %19 = vector.multi_reduction <add>, %18, %cst_5 [0] : vector<8x128xf32> to vector<128xf32>
    %20 = vector.shape_cast %19 : vector<128xf32> to vector<1x128xf32>
    %21 = arith.subf %20, %6 : vector<1x128xf32>
    %22 = arith.subf %21, %12 : vector<1x128xf32>
    %cst_6 = arith.constant -9.21034049 : f32
    %cst_7 = arith.constant 0.000000e+00 : f32
    %23 = vector.broadcast %cst_6 : f32 to vector<1x128xf32>
    %24 = arith.maximumf %23, %22 : vector<1x128xf32>
    %25 = vector.broadcast %cst_7 : f32 to vector<1x128xf32>
    %26 = arith.minimumf %25, %24 : vector<1x128xf32>
    %27 = math.exp %26 : vector<1x128xf32>
    %cst_8 = arith.constant 1.000000e+00 : f32
    %28 = vector.broadcast %cst_8 : f32 to vector<1x128xf32>
    %29 = arith.subf %28, %27 : vector<1x128xf32>
    %cst_9 = arith.constant 1.000000e+00 : f32
    %30 = vector.broadcast %cst_9 : f32 to vector<1x128xf32>
    %31 = arith.mulf %30, %29 : vector<1x128xf32>
    %32 = arith.mulf %31, %29 : vector<1x128xf32>
    %cst_10 = arith.constant 0.000000e+00 : f32
    %33 = vector.broadcast %cst_10 : f32 to vector<1x128xf32>
    %34 = arith.subf %33, %32 : vector<1x128xf32>
    %35 = arith.mulf %34, %26 : vector<1x128xf32>
    %36 = tpu.iota {dimensions = array<i32: 1>} : vector<1x128xi32>
    %c128_i32 = arith.constant 128 : i32
    %37 = arith.muli %arg0, %c128_i32 : i32
    %38 = vector.broadcast %37 : i32 to vector<1x128xi32>
    %39 = arith.addi %38, %36 : vector<1x128xi32>
    %c16_i32 = arith.constant 16 : i32
    %40 = vector.broadcast %c16_i32 : i32 to vector<1x128xi32>
    %41 = arith.cmpi slt, %39, %40 : vector<1x128xi32>
    %cst_11 = arith.constant 0.000000e+00 : f32
    %42 = vector.broadcast %cst_11 : f32 to vector<1x128xf32>
    %43 = arith.select %41, %35, %42 : vector<1x128xi1>, vector<1x128xf32>
    %c0_12 = arith.constant 0 : index
    %c0_13 = arith.constant 0 : index
    %44 = vector.load %arg3[%c0_12, %c0_13] : memref<1x1xf32, #tpu.memory_space<vmem>>, vector<1x1xf32>
    %45 = vector.shape_cast %43 : vector<1x128xf32> to vector<1x1x128xf32>
    %cst_14 = arith.constant dense<0.000000e+00> : vector<1xf32>
    %46 = vector.multi_reduction <add>, %45, %cst_14 [1, 2] : vector<1x1x128xf32> to vector<1xf32>
    %47 = vector.shape_cast %46 : vector<1xf32> to vector<1x1x1xf32>
    %48 = vector.extract %47[0, 0, 0] : f32 from vector<1x1x1xf32>
    %49 = vector.broadcast %48 : f32 to vector<1x1xf32>
    %50 = arith.addf %44, %49 : vector<1x1xf32>
    %c0_15 = arith.constant 0 : index
    %c0_16 = arith.constant 0 : index
    %51 = vector.load %arg3[%c0_15, %c0_16] : memref<1x1xf32, #tpu.memory_space<vmem>>, vector<1x1xf32>
    tpu.vector_store %arg3[%c0_15, %c0_16], %50 {strides = array<i32>} : memref<1x1xf32, #tpu.memory_space<vmem>>, vector<1x1xf32>,
    %c0_i32_17 = arith.constant 0 : i32
    %52 = arith.cmpi eq, %arg0, %c0_i32_17 : i32
    %53 = arith.extui %52 : i1 to i32
    %c0_i32_18 = arith.constant 0 : i32
    %54 = arith.cmpi ne, %53, %c0_i32_18 : i32
    scf.if %54 {
      %c0_19 = arith.constant 0 : index
      %c0_20 = arith.constant 0 : index
      %55 = vector.load %arg3[%c0_19, %c0_20] : memref<1x1xf32, #tpu.memory_space<vmem>>, vector<1x1xf32>
      %cst_21 = arith.constant 1.600000e+01 : f32
      %56 = vector.broadcast %cst_21 : f32 to vector<1x1xf32>
      %57 = arith.divf %55, %56 : vector<1x1xf32>
      %c0_22 = arith.constant 0 : index
      %c0_23 = arith.constant 0 : index
      %58 = vector.load %arg3[%c0_22, %c0_23] : memref<1x1xf32, #tpu.memory_space<vmem>>, vector<1x1xf32>
      tpu.vector_store %arg3[%c0_22, %c0_23], %57 {strides = array<i32>} : memref<1x1xf32, #tpu.memory_space<vmem>>, vector<1x1xf32>,
    } else {
    }
    return
  }
  func.func @transform_0(%arg0: i32) -> (i32, i32) {
    %c0_i32 = arith.constant 0 : i32
    %c0_i32_0 = arith.constant 0 : i32
    return %c0_i32, %arg0 : i32, i32
  }
  func.func @transform_1(%arg0: i32) -> (i32, i32) {
    %c0_i32 = arith.constant 0 : i32
    %c0_i32_0 = arith.constant 0 : i32
    return %c0_i32, %arg0 : i32, i32
  }
  func.func @transform_2(%arg0: i32) -> (i32, i32) {
    %c0_i32 = arith.constant 0 : i32
    %c0_i32_0 = arith.constant 0 : i32
    %c0_i32_1 = arith.constant 0 : i32
    return %c0_i32, %c0_i32_0 : i32, i32
  }
}

</mosaic_0001>

<bundles_post_ra>
// kernel: tpu_custom_call.1
= control target key start
LH: loop header
LB: loop body
LE: loop exit
PB: predicated region body
PF: predicated region fallthrough
CT: control target
= control target key end

     0   :  { %7 = vsyncpa [#allocation3], 0  ;;  %s229_s0 = inlined_call_operand.hbm [shape: f32[8,128], index: 0, kind: input, shape index: {}]   ;;  %s230_s1 = inlined_call_operand.vmem [shape: s32[1,128], index: 1, kind: input, shape index: {}]   ;;  %s231_s2 = inlined_call_operand.hbm [shape: f32[1,1], index: 2, kind: output, shape index: {}]  }
   0x1   :  { %8 = vsyncpa [#allocation4], 0  ;;  %s181_s9 = smov [#allocation2]   ;;  %s133_s13 = scalar_lea.hbm %s229_s0, 128 }
   0x2   :  { %s15_s10 = sshll.u32 %s181_s9, 4  ;;  %p134_p0 = scmp.ne.s32.totalorder %s229_s0, %s133_s13  ;;  %s16_s10 = int_to_ptr.vmem [resolvable:$true] %s15_s10 }
   0x3   :  { %p137_p1 = scmp.lt.u32.totalorder %s133_s13, %s229_s0 }
   0x5   :  { %p139_p2 = pnand %p137_p1, %p134_p0 }
   0x7   :  { %142 = shalt.err (!%p139_p2)
}
   0x8   :  { %s143_s18 = scalar_lea.vmem %s16_s10, 128  ;;  %p148_p4 = scmp.lt.s32.totalorder %s16_s10, %s16_s10 }
   0x9   :  { %p144_p3 = scmp.ne.s32.totalorder %s16_s10, %s143_s18  ;;  %p149_p5 = scmp.lt.s32.totalorder %s143_s18, %s143_s18 }
   0xb   :  { %p150_p6 = por %p149_p5, %p148_p4 }
   0xd   :  { %p151_p7 = pnand %p150_p6, %p144_p3 }
   0xf   :  { %154 = shalt.err (!%p151_p7)
}
  0x10   :  { %18 = dma.hbm_to_vmem [thread:$0]  %s229_s0, 128, %s16_s10, [#allocation3]  }
  0x11   :  { %177 = dma.done.wait [#allocation3], 128  }
  0x12   :  { %178 = vsyncadd [#allocation3], 4294967168  ;;  %v30_v0 = vld [vmem:[#allocation2] sm:$0xff]  ;;  %v49_v5 = vlaneseq  ;;  %v182_v12 = vmov 0.0   ;;  %vm83_vm2 = vcmask 1040384   ;;  %vm28_vm3 = vcmask 0  }
  0x13   :  { %v32_v1 = vrot.slane %v30_v0, 4  ;;  %v120_v9 = vld [vmem:[%s230_s1] ss:$0 sm:$0xff]  ;;  %29 = vst.msk [vmem:[#allocation5] sm:$0x1] %vm28_vm3, %v182_v12  ;;  %s183_s1 = smov [#allocation5]  }
  0x14   :  { %v50_v8 = vshrl.u32 %v49_v5, 7  ;;  %v76_v37 = vand.u32 127, %v49_v5  ;;  %s111_s23 = sshll.u32 %s183_s1, 4  ;;  %s112_s23 = int_to_ptr.vmem [resolvable:$true] %s111_s23 }
  0x15   :  { %v33_v2 = vmax.f32 %v30_v0, %v32_v1  ;;  %s155_s24 = scalar_lea.vmem %s112_s23, 16  ;;  %s159_s25 = scalar_lea.vmem %s112_s23, 32 }
  0x16   :  { %vm55_vm0 = vcmp.eq.s32.totalorder %v50_v8, %v120_v9  ;;  %vm80_vm1 = vcmp.lt.s32.totalorder %v76_v37, 16  ;;  %p156_p8 = scmp.ne.s32.totalorder %s112_s23, %s155_s24  ;;  %p160_p9 = scmp.lt.s32.totalorder %s112_s23, %s112_s23 }
  0x17   :  { %v34_v3 = vrot.slane %v33_v2, 2  ;;  %v121_v13 = vsel %vm55_vm0, 1.0, %v182_v12  ;;  %p161_p10 = scmp.lt.s32.totalorder %s159_s25, %s155_s24 }
  0x18   :  { %v58_v14 = vmul.f32 %v121_v13, %v30_v0 }
  0x19   :  { %v35_v4 = vmax.f32 %v33_v2, %v34_v3  ;;  %p162_p11 = por %p161_p10, %p160_p9 }
  0x1a   :  { %v59_v15 = vrot.slane %v58_v14, 4  ;;  %v82_v50 = vld [vmem:[#allocation5] sm:$0x1] }
  0x1b   :  { %v36_v6 = vrot.slane %v35_v4, 1  ;;  %p163_p12 = pnand %p162_p11, %p156_p8 }
  0x1c   :  { %v60_v18 = vadd.f32 %v59_v15, %v58_v14 }
  0x1d   :  { %v37_v7 = vmax.f32 %v35_v4, %v36_v6 }
  0x1e   :  { %v61_v21 = vrot.slane %v60_v18, 2 }
  0x1f   :  { %v38_v10 = vsub.f32 %v30_v0, %v37_v7 }
  0x20   :  { %v62_v24 = vadd.f32 %v61_v21, %v60_v18 }
  0x21   :  { %v39_v11 = vmul.f32 1.442695, %v38_v10 }
  0x22   :  { %v63_v26 = vrot.slane %v62_v24, 1 }
  0x23   :  { %127 = vpow2.f32 %v39_v11 }
  0x24   :  { %v64_v27 = vadd.f32 %v63_v26, %v62_v24 }
  0x26   :  { %v65_v28 = vsub.f32 %v64_v27, %v37_v7 }
  0x2d   :  { %v128_v16 = vpop.eup %127 }
  0x2e   :  { %v41_v17 = vrot.slane %v128_v16, 4 }
  0x30   :  { %v42_v19 = vadd.f32 %v128_v16, %v41_v17 }
  0x32   :  { %v43_v20 = vrot.slane %v42_v19, 2 }
  0x34   :  { %v44_v22 = vadd.f32 %v43_v20, %v42_v19 }
  0x36   :  { %v45_v23 = vrot.slane %v44_v22, 1 }
  0x38   :  { %v46_v25 = vadd.f32 %v45_v23, %v44_v22 }
  0x3a   :  { %129 = vlog2.f32 %v46_v25 }
  0x44   :  { %v130_v29 = vpop.eup %129 }
  0x45   :  { %v48_v30 = vmul.f32 0.6931472, %v130_v29 }
  0x47   :  { %v66_v31 = vsub.f32 %v65_v28, %v48_v30 }
  0x49   :  { %v67_v32 = vmax.f32 %v66_v31, -9.2103405 }
  0x4b   :  { %v68_v33 = vmin.f32 %v67_v32, 0.0 }
  0x4d   :  { %v69_v34 = vmul.f32 1.442695, %v68_v33 }
  0x4f   :  { %131 = vpow2.f32 %v69_v34 }
  0x59   :  { %v132_v35 = vpop.eup %131 }
  0x5a   :  { %v71_v36 = vsub.f32 1.0, %v132_v35 }
  0x5c   :  { %v72_v38 = vmul.f32 %v71_v36, %v71_v36 }
  0x5e   :  { %v73_v39 = vsub.f32 0.0, %v72_v38 }
  0x60   :  { %v74_v40 = vmul.f32 %v73_v39, %v68_v33 }
  0x62   :  { %v81_v41 = vsel %vm80_vm1, %v74_v40, 0.0 }
  0x63   :  { %v84_v42 = vsel %vm83_vm2, %v81_v41, 0.0 }
  0x64   :  { %85 = vadd.xlane.f32.xlu0 %v84_v42 }
  0xf1   :  { %v86_v43 = vpop.xlane.xlu0 %85 }
  0xf2   :  { %v87_v44 = vrot.slane %v86_v43, 4 }
  0xf4   :  { %v88_v45 = vadd.f32 %v87_v44, %v86_v43 }
  0xf6   :  { %v89_v46 = vrot.slane %v88_v45, 2 }
  0xf8   :  { %v90_v47 = vadd.f32 %v89_v46, %v88_v45 }
  0xfa   :  { %v91_v48 = vrot.slane %v90_v47, 1 }
  0xfc   :  { %v92_v49 = vadd.f32 %v91_v48, %v90_v47 }
  0xfe   :  { %122 = vpush %v92_v49 }
 0x12f   :  { %s123_s0 = spop %122 }
 0x130   :  { %v94_v51 = vstv %s123_s0 }
 0x131   :  { %v95_v52 = vadd.f32 %v94_v51, %v82_v50 }
 0x133   :  { %97 = vst.msk [vmem:[#allocation5] sm:$0x1] %vm28_vm3, %v95_v52 }
 0x13a   :  { %v101_v53 = vld [vmem:[#allocation5] sm:$0x1] }
 0x13b   :  { %v103_v54 = vmul.f32 0.0625, %v101_v53 }
 0x13d   :  { %104 = vst.msk [vmem:[#allocation5] sm:$0x1] %vm28_vm3, %v103_v54 }
 0x13e   :  { %166 = shalt.err (!%p163_p12)
}
 0x13f   :  { %s167_s28 = scalar_lea.hbm %s231_s2, 16 }
 0x140   :  { %p168_p13 = scmp.ne.s32.totalorder %s231_s2, %s167_s28  ;;  %p171_p0 = scmp.lt.u32.totalorder %s167_s28, %s231_s2 }
 0x142   :  { %p173_p1 = pnand %p171_p0, %p168_p13 }
 0x144   :  { %176 = shalt.err (!%p173_p1)
}
 0x145   :  { %114 = dma.vmem_to_hbm [thread:$0]  %s112_s23, 16, %s231_s2, [#allocation4]  }
 0x146   :  { %179 = dma.done.wait [#allocation4], 16  }
 0x147   :  { %180 = vsyncadd [#allocation4], 4294967280 }
 0x148   :  { %118 = vsyncpa [#allocation3], 1 }
 0x149   :  { %119 = vsyncpa [#allocation4], 1 }

</bundles_post_ra>
